<compile_context>
chip_gen: v7x
topology: tpu7x:2x2x1
jax: 0.10.0
libtpu: 0.0.40
codegen_flags: <defaults>
</compile_context>

<pallas_src>
import jax
import jax.numpy as jnp
from jax.experimental import pallas as pl
from jax.experimental.pallas import tpu as pltpu


# ----------------------------------------------------------------------------
# Fused full-sequence LSTM kernel (single invocation, no grid).
# ----------------------------------------------------------------------------
def _lstm_seq_kernel(x2d_ref, wih_ref, whh_ref, b_ref, h0_ref, c0_ref,
                     out_ref, hn_ref, cn_ref):
    B, H = h0_ref.shape
    S = out_ref.shape[0]

    # ---- hoisted input projection: ONE lane-dense GEMM over all timesteps --
    # x2d: (S*B, I) @ wih_cat: (I, 4H)  ->  gx: (S*B, 4H) f32, gate order i,f,g,o.
    gx = jnp.dot(x2d_ref[...], wih_ref[...],
                 preferred_element_type=jnp.float32) + b_ref[...]

    # Recurrent weights loaded into vregs once: (H, 4H), lane-dense.
    whh = whh_ref[...]

    h = h0_ref[...].astype(jnp.float32)
    c = c0_ref[...].astype(jnp.float32)

    # ---- fully unrolled recurrent loop (S static & small) ------------------
    # Per step: one (B,H)@(H,4H) MXU dot, one whole-vreg sigmoid, one
    # whole-vreg tanh, static lane slices per gate, tanh(c) + VPU math.
    for t in range(S):
        pre = gx[t * B:(t + 1) * B] + jnp.dot(
            h, whh, preferred_element_type=jnp.float32)        # (B, 4H)
        sig = jax.nn.sigmoid(pre)                               # 1 EUP push
        tnh = jnp.tanh(pre)                                     # 1 EUP push
        i_t = sig[:, 0 * H:1 * H]
        f_t = sig[:, 1 * H:2 * H]
        g_t = tnh[:, 2 * H:3 * H]
        o_t = sig[:, 3 * H:4 * H]
        c = f_t * c + i_t * g_t
        h = o_t * jnp.tanh(c)                                   # 1 EUP push
        out_ref[t] = h.astype(out_ref.dtype)   # tiny VMEM write; HBM once at end

    hn_ref[...] = h.astype(hn_ref.dtype)
    cn_ref[...] = c.astype(cn_ref.dtype)


def _lstm_forward_impl(x, h0, c0, wih_cat, whh_cat, b_cat):
    """x: (S, B, I); h0/c0: (B, H); wih_cat: (I, 4H); whh_cat: (H, 4H);
    b_cat: (1, 4H).  Gate order along the 4H axis is [i, f, g, o]."""
    S, B, I = x.shape
    H = h0.shape[-1]
    x2d = x.reshape(S * B, I)                 # XLA-side reshape (free)

    f32 = 4
    cost = pl.CostEstimate(
        flops=2 * S * B * I * 4 * H            # input projection GEMM
              + 2 * S * B * H * 4 * H          # recurrent dots
              + 10 * S * B * H,                # gate elementwise math
        transcendentals=S * (2 * B * 4 * H + B * H),
        bytes_accessed=f32 * (S * B * I + I * 4 * H + H * 4 * H + 4 * H
                              + 2 * B * H            # h0, c0 in
                              + S * B * H + 2 * B * H),  # out, h_n, c_n
    )

    vmem = pl.BlockSpec(memory_space=pltpu.MemorySpace.VMEM)
    out, h_n, c_n = pl.pallas_call(
        _lstm_seq_kernel,
        out_shape=(jax.ShapeDtypeStruct((S, B, H), x.dtype),
                   jax.ShapeDtypeStruct((B, H), x.dtype),
                   jax.ShapeDtypeStruct((B, H), x.dtype)),
        in_specs=[vmem] * 6,
        out_specs=(vmem, vmem, vmem),
        input_output_aliases={4: 1, 5: 2},    # h0 -> h_n, c0 -> c_n
        cost_estimate=cost,
    )(x2d, wih_cat, whh_cat, b_cat, h0, c0)
    return out, h_n, c_n


lstm_forward = jax.jit(_lstm_forward_impl)


# ----------------------------------------------------------------------------
# Module wrapper matching the PyTorch LSTMController.
# ----------------------------------------------------------------------------
class LSTMController:
    def __init__(self, input_size, hidden_size, key=jax.random.PRNGKey(0)):
        self.input_size = input_size
        self.hidden_size = hidden_size
        H, I = hidden_size, input_size
        bnd = 1.0 / float(H) ** 0.5                    # PyTorch nn.LSTM init
        k = jax.random.split(key, 4)
        # PyTorch-layout parameters (gate order [i, f, g, o] along 4H).
        self.w_ih = jax.random.uniform(k[0], (4 * H, I), jnp.float32, -bnd, bnd)
        self.w_hh = jax.random.uniform(k[1], (4 * H, H), jnp.float32, -bnd, bnd)
        self.b_ih = jax.random.uniform(k[2], (4 * H,), jnp.float32, -bnd, bnd)
        self.b_hh = jax.random.uniform(k[3], (4 * H,), jnp.float32, -bnd, bnd)
        # Kernel-layout parameters, built ONCE (not per forward call):
        # x @ W_ih^T == x @ wih_cat,  h @ W_hh^T == h @ whh_cat,
        # gates concatenated along the lane (output) axis.
        self.wih_cat = jnp.asarray(self.w_ih.T)              # (I, 4H)
        self.whh_cat = jnp.asarray(self.w_hh.T)              # (H, 4H)
        self.b_cat = (self.b_ih + self.b_hh).reshape(1, 4 * H)

    def init_state(self, batch_size):
        H = self.hidden_size
        return (jnp.zeros((1, batch_size, H), jnp.float32),
                jnp.zeros((1, batch_size, H), jnp.float32))

    def forward(self, x, prev_state):
        h0, c0 = prev_state
        out, h_n, c_n = lstm_forward(x, h0[0], c0[0],
                                     self.wih_cat, self.whh_cat, self.b_cat)
        return out, (h_n[None], c_n[None])


# ----------------------------------------------------------------------------
# Pure-JAX reference (PyTorch nn.LSTM semantics).
# ----------------------------------------------------------------------------
def _lstm_ref(x, h0, c0, w_ih, w_hh, b_ih, b_hh):
    def step(carry, x_t):
        h, c = carry
        gates = x_t @ w_ih.T + b_ih + h @ w_hh.T + b_hh
        i, f, g, o = jnp.split(gates, 4, axis=-1)
        i, f, o = jax.nn.sigmoid(i), jax.nn.sigmoid(f), jax.nn.sigmoid(o)
        g = jnp.tanh(g)
        c = f * c + i * g
        h = o * jnp.tanh(c)
        return (h, c), h

    (h_n, c_n), out = jax.lax.scan(step, (h0, c0), x)
    return out, h_n, c_n


if __name__ == "__main__":
    S, B = 8, 2
    input_size, hidden_size = 8, 32

    key = jax.random.PRNGKey(0)
    kx, kp = jax.random.split(key)
    x = jax.random.normal(kx, (S, B, input_size), jnp.float32)

    ctrl = LSTMController(input_size, hidden_size, key=kp)
    state0 = ctrl.init_state(B)

    out, (h_n, c_n) = ctrl.forward(x, state0)
    jax.block_until_ready((out, h_n, c_n))

    assert out.shape == (S, B, hidden_size)
    assert h_n.shape == (1, B, hidden_size) and c_n.shape == (1, B, hidden_size)

    ref_out, ref_h, ref_c = _lstm_ref(x, state0[0][0], state0[1][0],
                                      ctrl.w_ih, ctrl.w_hh, ctrl.b_ih, ctrl.b_hh)
    assert jnp.max(jnp.abs(out - ref_out)) < 1e-4
    assert jnp.max(jnp.abs(h_n[0] - ref_h)) < 1e-4
    assert jnp.max(jnp.abs(c_n[0] - ref_c)) < 1e-4

    print("KERNEL_OK")
</pallas_src>

<mosaic_0001>
module attributes {stable_mosaic.version = 11 : i64} {
  func.func @_lstm_seq_kernel(%arg0: memref<16x8xf32, #tpu.memory_space<vmem>>, %arg1: memref<8x128xf32, #tpu.memory_space<vmem>>, %arg2: memref<32x128xf32, #tpu.memory_space<vmem>>, %arg3: memref<1x128xf32, #tpu.memory_space<vmem>>, %arg4: memref<2x32xf32, #tpu.memory_space<vmem>>, %arg5: memref<2x32xf32, #tpu.memory_space<vmem>>, %arg6: memref<8x2x32xf32, #tpu.memory_space<vmem>>, %arg7: memref<2x32xf32, #tpu.memory_space<vmem>>, %arg8: memref<2x32xf32, #tpu.memory_space<vmem>>) attributes {dimension_semantics = [], scalar_prefetch = 0 : i64, scratch_operands = 0 : i64, tpu.core_type = #tpu.core_type<tc>} {
    %c0 = arith.constant 0 : index
    %c0_0 = arith.constant 0 : index
    %0 = vector.load %arg0[%c0, %c0_0] : memref<16x8xf32, #tpu.memory_space<vmem>>, vector<16x8xf32>
    %c0_1 = arith.constant 0 : index
    %c0_2 = arith.constant 0 : index
    %1 = vector.load %arg1[%c0_1, %c0_2] : memref<8x128xf32, #tpu.memory_space<vmem>>, vector<8x128xf32>
    %cst = arith.constant dense<0.000000e+00> : vector<16x128xf32>
    %2 = tpu.matmul %0, %1, %cst {dimension_numbers = #tpu.dot_dimension_numbers<[1], [0], [0], [1], [0, 0, 1, 1], [], []>} : vector<16x8xf32>, vector<8x128xf32>, vector<16x128xf32> -> vector<16x128xf32>
    %c0_3 = arith.constant 0 : index
    %c0_4 = arith.constant 0 : index
    %3 = vector.load %arg3[%c0_3, %c0_4] : memref<1x128xf32, #tpu.memory_space<vmem>>, vector<1x128xf32>
    %4 = vector.broadcast %3 : vector<1x128xf32> to vector<16x128xf32>
    %5 = arith.addf %2, %4 : vector<16x128xf32>
    %c0_5 = arith.constant 0 : index
    %c0_6 = arith.constant 0 : index
    %6 = vector.load %arg2[%c0_5, %c0_6] : memref<32x128xf32, #tpu.memory_space<vmem>>, vector<32x128xf32>
    %c0_7 = arith.constant 0 : index
    %c0_8 = arith.constant 0 : index
    %7 = vector.load %arg4[%c0_7, %c0_8] : memref<2x32xf32, #tpu.memory_space<vmem>>, vector<2x32xf32>
    %c0_9 = arith.constant 0 : index
    %c0_10 = arith.constant 0 : index
    %8 = vector.load %arg5[%c0_9, %c0_10] : memref<2x32xf32, #tpu.memory_space<vmem>>, vector<2x32xf32>
    %9 = vector.extract_strided_slice %5 {offsets = [0, 0], sizes = [2, 128], strides = [1, 1]} : vector<16x128xf32> to vector<2x128xf32>
    %cst_11 = arith.constant dense<0.000000e+00> : vector<2x128xf32>
    %10 = tpu.matmul %7, %6, %cst_11 {dimension_numbers = #tpu.dot_dimension_numbers<[1], [0], [0], [1], [0, 0, 1, 1], [], []>} : vector<2x32xf32>, vector<32x128xf32>, vector<2x128xf32> -> vector<2x128xf32>
    %11 = arith.addf %9, %10 : vector<2x128xf32>
    %12 = arith.negf %11 : vector<2x128xf32>
    %13 = math.exp %12 : vector<2x128xf32>
    %cst_12 = arith.constant 1.000000e+00 : f32
    %14 = vector.broadcast %cst_12 : f32 to vector<2x128xf32>
    %15 = arith.addf %14, %13 : vector<2x128xf32>
    %16 = arith.divf %14, %15 : vector<2x128xf32>
    %17 = math.tanh %11 : vector<2x128xf32>
    %18 = vector.extract_strided_slice %16 {offsets = [0, 0], sizes = [2, 32], strides = [1, 1]} : vector<2x128xf32> to vector<2x32xf32>
    %19 = vector.extract_strided_slice %16 {offsets = [0, 32], sizes = [2, 32], strides = [1, 1]} : vector<2x128xf32> to vector<2x32xf32>
    %20 = vector.extract_strided_slice %17 {offsets = [0, 64], sizes = [2, 32], strides = [1, 1]} : vector<2x128xf32> to vector<2x32xf32>
    %21 = vector.extract_strided_slice %16 {offsets = [0, 96], sizes = [2, 32], strides = [1, 1]} : vector<2x128xf32> to vector<2x32xf32>
    %22 = arith.mulf %19, %8 : vector<2x32xf32>
    %23 = arith.mulf %18, %20 : vector<2x32xf32>
    %24 = arith.addf %22, %23 : vector<2x32xf32>
    %25 = math.tanh %24 : vector<2x32xf32>
    %26 = arith.mulf %21, %25 : vector<2x32xf32>
    %c0_13 = arith.constant 0 : index
    %c0_14 = arith.constant 0 : index
    %c0_15 = arith.constant 0 : index
    %27 = vector.load %arg6[%c0_13, %c0_14, %c0_15] : memref<8x2x32xf32, #tpu.memory_space<vmem>>, vector<1x2x32xf32>
    %28 = vector.shape_cast %27 : vector<1x2x32xf32> to vector<2x32xf32>
    %29 = vector.shape_cast %26 : vector<2x32xf32> to vector<1x2x32xf32>
    tpu.vector_store %arg6[%c0_13, %c0_14, %c0_15], %29 {strides = array<i32>} : memref<8x2x32xf32, #tpu.memory_space<vmem>>, vector<1x2x32xf32>,
    %30 = vector.extract_strided_slice %5 {offsets = [2, 0], sizes = [2, 128], strides = [1, 1]} : vector<16x128xf32> to vector<2x128xf32>
    %cst_16 = arith.constant dense<0.000000e+00> : vector<2x128xf32>
    %31 = tpu.matmul %26, %6, %cst_16 {dimension_numbers = #tpu.dot_dimension_numbers<[1], [0], [0], [1], [0, 0, 1, 1], [], []>} : vector<2x32xf32>, vector<32x128xf32>, vector<2x128xf32> -> vector<2x128xf32>
    %32 = arith.addf %30, %31 : vector<2x128xf32>
    %33 = arith.negf %32 : vector<2x128xf32>
    %34 = math.exp %33 : vector<2x128xf32>
    %cst_17 = arith.constant 1.000000e+00 : f32
    %35 = vector.broadcast %cst_17 : f32 to vector<2x128xf32>
    %36 = arith.addf %35, %34 : vector<2x128xf32>
    %37 = arith.divf %35, %36 : vector<2x128xf32>
    %38 = math.tanh %32 : vector<2x128xf32>
    %39 = vector.extract_strided_slice %37 {offsets = [0, 0], sizes = [2, 32], strides = [1, 1]} : vector<2x128xf32> to vector<2x32xf32>
    %40 = vector.extract_strided_slice %37 {offsets = [0, 32], sizes = [2, 32], strides = [1, 1]} : vector<2x128xf32> to vector<2x32xf32>
    %41 = vector.extract_strided_slice %38 {offsets = [0, 64], sizes = [2, 32], strides = [1, 1]} : vector<2x128xf32> to vector<2x32xf32>
    %42 = vector.extract_strided_slice %37 {offsets = [0, 96], sizes = [2, 32], strides = [1, 1]} : vector<2x128xf32> to vector<2x32xf32>
    %43 = arith.mulf %40, %24 : vector<2x32xf32>
    %44 = arith.mulf %39, %41 : vector<2x32xf32>
    %45 = arith.addf %43, %44 : vector<2x32xf32>
    %46 = math.tanh %45 : vector<2x32xf32>
    %47 = arith.mulf %42, %46 : vector<2x32xf32>
    %c1 = arith.constant 1 : index
    %c0_18 = arith.constant 0 : index
    %c0_19 = arith.constant 0 : index
    %48 = vector.load %arg6[%c1, %c0_18, %c0_19] : memref<8x2x32xf32, #tpu.memory_space<vmem>>, vector<1x2x32xf32>
    %49 = vector.shape_cast %48 : vector<1x2x32xf32> to vector<2x32xf32>
    %50 = vector.shape_cast %47 : vector<2x32xf32> to vector<1x2x32xf32>
    tpu.vector_store %arg6[%c1, %c0_18, %c0_19], %50 {strides = array<i32>} : memref<8x2x32xf32, #tpu.memory_space<vmem>>, vector<1x2x32xf32>,
    %51 = vector.extract_strided_slice %5 {offsets = [4, 0], sizes = [2, 128], strides = [1, 1]} : vector<16x128xf32> to vector<2x128xf32>
    %cst_20 = arith.constant dense<0.000000e+00> : vector<2x128xf32>
    %52 = tpu.matmul %47, %6, %cst_20 {dimension_numbers = #tpu.dot_dimension_numbers<[1], [0], [0], [1], [0, 0, 1, 1], [], []>} : vector<2x32xf32>, vector<32x128xf32>, vector<2x128xf32> -> vector<2x128xf32>
    %53 = arith.addf %51, %52 : vector<2x128xf32>
    %54 = arith.negf %53 : vector<2x128xf32>
    %55 = math.exp %54 : vector<2x128xf32>
    %cst_21 = arith.constant 1.000000e+00 : f32
    %56 = vector.broadcast %cst_21 : f32 to vector<2x128xf32>
    %57 = arith.addf %56, %55 : vector<2x128xf32>
    %58 = arith.divf %56, %57 : vector<2x128xf32>
    %59 = math.tanh %53 : vector<2x128xf32>
    %60 = vector.extract_strided_slice %58 {offsets = [0, 0], sizes = [2, 32], strides = [1, 1]} : vector<2x128xf32> to vector<2x32xf32>
    %61 = vector.extract_strided_slice %58 {offsets = [0, 32], sizes = [2, 32], strides = [1, 1]} : vector<2x128xf32> to vector<2x32xf32>
    %62 = vector.extract_strided_slice %59 {offsets = [0, 64], sizes = [2, 32], strides = [1, 1]} : vector<2x128xf32> to vector<2x32xf32>
    %63 = vector.extract_strided_slice %58 {offsets = [0, 96], sizes = [2, 32], strides = [1, 1]} : vector<2x128xf32> to vector<2x32xf32>
    %64 = arith.mulf %61, %45 : vector<2x32xf32>
    %65 = arith.mulf %60, %62 : vector<2x32xf32>
    %66 = arith.addf %64, %65 : vector<2x32xf32>
    %67 = math.tanh %66 : vector<2x32xf32>
    %68 = arith.mulf %63, %67 : vector<2x32xf32>
    %c2 = arith.constant 2 : index
    %c0_22 = arith.constant 0 : index
    %c0_23 = arith.constant 0 : index
    %69 = vector.load %arg6[%c2, %c0_22, %c0_23] : memref<8x2x32xf32, #tpu.memory_space<vmem>>, vector<1x2x32xf32>
    %70 = vector.shape_cast %69 : vector<1x2x32xf32> to vector<2x32xf32>
    %71 = vector.shape_cast %68 : vector<2x32xf32> to vector<1x2x32xf32>
    tpu.vector_store %arg6[%c2, %c0_22, %c0_23], %71 {strides = array<i32>} : memref<8x2x32xf32, #tpu.memory_space<vmem>>, vector<1x2x32xf32>,
    %72 = vector.extract_strided_slice %5 {offsets = [6, 0], sizes = [2, 128], strides = [1, 1]} : vector<16x128xf32> to vector<2x128xf32>
    %cst_24 = arith.constant dense<0.000000e+00> : vector<2x128xf32>
    %73 = tpu.matmul %68, %6, %cst_24 {dimension_numbers = #tpu.dot_dimension_numbers<[1], [0], [0], [1], [0, 0, 1, 1], [], []>} : vector<2x32xf32>, vector<32x128xf32>, vector<2x128xf32> -> vector<2x128xf32>
    %74 = arith.addf %72, %73 : vector<2x128xf32>
    %75 = arith.negf %74 : vector<2x128xf32>
    %76 = math.exp %75 : vector<2x128xf32>
    %cst_25 = arith.constant 1.000000e+00 : f32
    %77 = vector.broadcast %cst_25 : f32 to vector<2x128xf32>
    %78 = arith.addf %77, %76 : vector<2x128xf32>
    %79 = arith.divf %77, %78 : vector<2x128xf32>
    %80 = math.tanh %74 : vector<2x128xf32>
    %81 = vector.extract_strided_slice %79 {offsets = [0, 0], sizes = [2, 32], strides = [1, 1]} : vector<2x128xf32> to vector<2x32xf32>
    %82 = vector.extract_strided_slice %79 {offsets = [0, 32], sizes = [2, 32], strides = [1, 1]} : vector<2x128xf32> to vector<2x32xf32>
    %83 = vector.extract_strided_slice %80 {offsets = [0, 64], sizes = [2, 32], strides = [1, 1]} : vector<2x128xf32> to vector<2x32xf32>
    %84 = vector.extract_strided_slice %79 {offsets = [0, 96], sizes = [2, 32], strides = [1, 1]} : vector<2x128xf32> to vector<2x32xf32>
    %85 = arith.mulf %82, %66 : vector<2x32xf32>
    %86 = arith.mulf %81, %83 : vector<2x32xf32>
    %87 = arith.addf %85, %86 : vector<2x32xf32>
    %88 = math.tanh %87 : vector<2x32xf32>
    %89 = arith.mulf %84, %88 : vector<2x32xf32>
    %c3 = arith.constant 3 : index
    %c0_26 = arith.constant 0 : index
    %c0_27 = arith.constant 0 : index
    %90 = vector.load %arg6[%c3, %c0_26, %c0_27] : memref<8x2x32xf32, #tpu.memory_space<vmem>>, vector<1x2x32xf32>
    %91 = vector.shape_cast %90 : vector<1x2x32xf32> to vector<2x32xf32>
    %92 = vector.shape_cast %89 : vector<2x32xf32> to vector<1x2x32xf32>
    tpu.vector_store %arg6[%c3, %c0_26, %c0_27], %92 {strides = array<i32>} : memref<8x2x32xf32, #tpu.memory_space<vmem>>, vector<1x2x32xf32>,
    %93 = vector.extract_strided_slice %5 {offsets = [8, 0], sizes = [2, 128], strides = [1, 1]} : vector<16x128xf32> to vector<2x128xf32>
    %cst_28 = arith.constant dense<0.000000e+00> : vector<2x128xf32>
    %94 = tpu.matmul %89, %6, %cst_28 {dimension_numbers = #tpu.dot_dimension_numbers<[1], [0], [0], [1], [0, 0, 1, 1], [], []>} : vector<2x32xf32>, vector<32x128xf32>, vector<2x128xf32> -> vector<2x128xf32>
    %95 = arith.addf %93, %94 : vector<2x128xf32>
    %96 = arith.negf %95 : vector<2x128xf32>
    %97 = math.exp %96 : vector<2x128xf32>
    %cst_29 = arith.constant 1.000000e+00 : f32
    %98 = vector.broadcast %cst_29 : f32 to vector<2x128xf32>
    %99 = arith.addf %98, %97 : vector<2x128xf32>
    %100 = arith.divf %98, %99 : vector<2x128xf32>
    %101 = math.tanh %95 : vector<2x128xf32>
    %102 = vector.extract_strided_slice %100 {offsets = [0, 0], sizes = [2, 32], strides = [1, 1]} : vector<2x128xf32> to vector<2x32xf32>
    %103 = vector.extract_strided_slice %100 {offsets = [0, 32], sizes = [2, 32], strides = [1, 1]} : vector<2x128xf32> to vector<2x32xf32>
    %104 = vector.extract_strided_slice %101 {offsets = [0, 64], sizes = [2, 32], strides = [1, 1]} : vector<2x128xf32> to vector<2x32xf32>
    %105 = vector.extract_strided_slice %100 {offsets = [0, 96], sizes = [2, 32], strides = [1, 1]} : vector<2x128xf32> to vector<2x32xf32>
    %106 = arith.mulf %103, %87 : vector<2x32xf32>
    %107 = arith.mulf %102, %104 : vector<2x32xf32>
    %108 = arith.addf %106, %107 : vector<2x32xf32>
    %109 = math.tanh %108 : vector<2x32xf32>
    %110 = arith.mulf %105, %109 : vector<2x32xf32>
    %c4 = arith.constant 4 : index
    %c0_30 = arith.constant 0 : index
    %c0_31 = arith.constant 0 : index
    %111 = vector.load %arg6[%c4, %c0_30, %c0_31] : memref<8x2x32xf32, #tpu.memory_space<vmem>>, vector<1x2x32xf32>
    %112 = vector.shape_cast %111 : vector<1x2x32xf32> to vector<2x32xf32>
    %113 = vector.shape_cast %110 : vector<2x32xf32> to vector<1x2x32xf32>
    tpu.vector_store %arg6[%c4, %c0_30, %c0_31], %113 {strides = array<i32>} : memref<8x2x32xf32, #tpu.memory_space<vmem>>, vector<1x2x32xf32>,
    %114 = vector.extract_strided_slice %5 {offsets = [10, 0], sizes = [2, 128], strides = [1, 1]} : vector<16x128xf32> to vector<2x128xf32>
    %cst_32 = arith.constant dense<0.000000e+00> : vector<2x128xf32>
    %115 = tpu.matmul %110, %6, %cst_32 {dimension_numbers = #tpu.dot_dimension_numbers<[1], [0], [0], [1], [0, 0, 1, 1], [], []>} : vector<2x32xf32>, vector<32x128xf32>, vector<2x128xf32> -> vector<2x128xf32>
    %116 = arith.addf %114, %115 : vector<2x128xf32>
    %117 = arith.negf %116 : vector<2x128xf32>
    %118 = math.exp %117 : vector<2x128xf32>
    %cst_33 = arith.constant 1.000000e+00 : f32
    %119 = vector.broadcast %cst_33 : f32 to vector<2x128xf32>
    %120 = arith.addf %119, %118 : vector<2x128xf32>
    %121 = arith.divf %119, %120 : vector<2x128xf32>
    %122 = math.tanh %116 : vector<2x128xf32>
    %123 = vector.extract_strided_slice %121 {offsets = [0, 0], sizes = [2, 32], strides = [1, 1]} : vector<2x128xf32> to vector<2x32xf32>
    %124 = vector.extract_strided_slice %121 {offsets = [0, 32], sizes = [2, 32], strides = [1, 1]} : vector<2x128xf32> to vector<2x32xf32>
    %125 = vector.extract_strided_slice %122 {offsets = [0, 64], sizes = [2, 32], strides = [1, 1]} : vector<2x128xf32> to vector<2x32xf32>
    %126 = vector.extract_strided_slice %121 {offsets = [0, 96], sizes = [2, 32], strides = [1, 1]} : vector<2x128xf32> to vector<2x32xf32>
    %127 = arith.mulf %124, %108 : vector<2x32xf32>
    %128 = arith.mulf %123, %125 : vector<2x32xf32>
    %129 = arith.addf %127, %128 : vector<2x32xf32>
    %130 = math.tanh %129 : vector<2x32xf32>
    %131 = arith.mulf %126, %130 : vector<2x32xf32>
    %c5 = arith.constant 5 : index
    %c0_34 = arith.constant 0 : index
    %c0_35 = arith.constant 0 : index
    %132 = vector.load %arg6[%c5, %c0_34, %c0_35] : memref<8x2x32xf32, #tpu.memory_space<vmem>>, vector<1x2x32xf32>
    %133 = vector.shape_cast %132 : vector<1x2x32xf32> to vector<2x32xf32>
    %134 = vector.shape_cast %131 : vector<2x32xf32> to vector<1x2x32xf32>
    tpu.vector_store %arg6[%c5, %c0_34, %c0_35], %134 {strides = array<i32>} : memref<8x2x32xf32, #tpu.memory_space<vmem>>, vector<1x2x32xf32>,
    %135 = vector.extract_strided_slice %5 {offsets = [12, 0], sizes = [2, 128], strides = [1, 1]} : vector<16x128xf32> to vector<2x128xf32>
    %cst_36 = arith.constant dense<0.000000e+00> : vector<2x128xf32>
    %136 = tpu.matmul %131, %6, %cst_36 {dimension_numbers = #tpu.dot_dimension_numbers<[1], [0], [0], [1], [0, 0, 1, 1], [], []>} : vector<2x32xf32>, vector<32x128xf32>, vector<2x128xf32> -> vector<2x128xf32>
    %137 = arith.addf %135, %136 : vector<2x128xf32>
    %138 = arith.negf %137 : vector<2x128xf32>
    %139 = math.exp %138 : vector<2x128xf32>
    %cst_37 = arith.constant 1.000000e+00 : f32
    %140 = vector.broadcast %cst_37 : f32 to vector<2x128xf32>
    %141 = arith.addf %140, %139 : vector<2x128xf32>
    %142 = arith.divf %140, %141 : vector<2x128xf32>
    %143 = math.tanh %137 : vector<2x128xf32>
    %144 = vector.extract_strided_slice %142 {offsets = [0, 0], sizes = [2, 32], strides = [1, 1]} : vector<2x128xf32> to vector<2x32xf32>
    %145 = vector.extract_strided_slice %142 {offsets = [0, 32], sizes = [2, 32], strides = [1, 1]} : vector<2x128xf32> to vector<2x32xf32>
    %146 = vector.extract_strided_slice %143 {offsets = [0, 64], sizes = [2, 32], strides = [1, 1]} : vector<2x128xf32> to vector<2x32xf32>
    %147 = vector.extract_strided_slice %142 {offsets = [0, 96], sizes = [2, 32], strides = [1, 1]} : vector<2x128xf32> to vector<2x32xf32>
    %148 = arith.mulf %145, %129 : vector<2x32xf32>
    %149 = arith.mulf %144, %146 : vector<2x32xf32>
    %150 = arith.addf %148, %149 : vector<2x32xf32>
    %151 = math.tanh %150 : vector<2x32xf32>
    %152 = arith.mulf %147, %151 : vector<2x32xf32>
    %c6 = arith.constant 6 : index
    %c0_38 = arith.constant 0 : index
    %c0_39 = arith.constant 0 : index
    %153 = vector.load %arg6[%c6, %c0_38, %c0_39] : memref<8x2x32xf32, #tpu.memory_space<vmem>>, vector<1x2x32xf32>
    %154 = vector.shape_cast %153 : vector<1x2x32xf32> to vector<2x32xf32>
    %155 = vector.shape_cast %152 : vector<2x32xf32> to vector<1x2x32xf32>
    tpu.vector_store %arg6[%c6, %c0_38, %c0_39], %155 {strides = array<i32>} : memref<8x2x32xf32, #tpu.memory_space<vmem>>, vector<1x2x32xf32>,
    %156 = vector.extract_strided_slice %5 {offsets = [14, 0], sizes = [2, 128], strides = [1, 1]} : vector<16x128xf32> to vector<2x128xf32>
    %cst_40 = arith.constant dense<0.000000e+00> : vector<2x128xf32>
    %157 = tpu.matmul %152, %6, %cst_40 {dimension_numbers = #tpu.dot_dimension_numbers<[1], [0], [0], [1], [0, 0, 1, 1], [], []>} : vector<2x32xf32>, vector<32x128xf32>, vector<2x128xf32> -> vector<2x128xf32>
    %158 = arith.addf %156, %157 : vector<2x128xf32>
    %159 = arith.negf %158 : vector<2x128xf32>
    %160 = math.exp %159 : vector<2x128xf32>
    %cst_41 = arith.constant 1.000000e+00 : f32
    %161 = vector.broadcast %cst_41 : f32 to vector<2x128xf32>
    %162 = arith.addf %161, %160 : vector<2x128xf32>
    %163 = arith.divf %161, %162 : vector<2x128xf32>
    %164 = math.tanh %158 : vector<2x128xf32>
    %165 = vector.extract_strided_slice %163 {offsets = [0, 0], sizes = [2, 32], strides = [1, 1]} : vector<2x128xf32> to vector<2x32xf32>
    %166 = vector.extract_strided_slice %163 {offsets = [0, 32], sizes = [2, 32], strides = [1, 1]} : vector<2x128xf32> to vector<2x32xf32>
    %167 = vector.extract_strided_slice %164 {offsets = [0, 64], sizes = [2, 32], strides = [1, 1]} : vector<2x128xf32> to vector<2x32xf32>
    %168 = vector.extract_strided_slice %163 {offsets = [0, 96], sizes = [2, 32], strides = [1, 1]} : vector<2x128xf32> to vector<2x32xf32>
    %169 = arith.mulf %166, %150 : vector<2x32xf32>
    %170 = arith.mulf %165, %167 : vector<2x32xf32>
    %171 = arith.addf %169, %170 : vector<2x32xf32>
    %172 = math.tanh %171 : vector<2x32xf32>
    %173 = arith.mulf %168, %172 : vector<2x32xf32>
    %c7 = arith.constant 7 : index
    %c0_42 = arith.constant 0 : index
    %c0_43 = arith.constant 0 : index
    %174 = vector.load %arg6[%c7, %c0_42, %c0_43] : memref<8x2x32xf32, #tpu.memory_space<vmem>>, vector<1x2x32xf32>
    %175 = vector.shape_cast %174 : vector<1x2x32xf32> to vector<2x32xf32>
    %176 = vector.shape_cast %173 : vector<2x32xf32> to vector<1x2x32xf32>
    tpu.vector_store %arg6[%c7, %c0_42, %c0_43], %176 {strides = array<i32>} : memref<8x2x32xf32, #tpu.memory_space<vmem>>, vector<1x2x32xf32>,
    %c0_44 = arith.constant 0 : index
    %c0_45 = arith.constant 0 : index
    %177 = vector.load %arg7[%c0_44, %c0_45] : memref<2x32xf32, #tpu.memory_space<vmem>>, vector<2x32xf32>
    tpu.vector_store %arg7[%c0_44, %c0_45], %173 {strides = array<i32>} : memref<2x32xf32, #tpu.memory_space<vmem>>, vector<2x32xf32>,
    %c0_46 = arith.constant 0 : index
    %c0_47 = arith.constant 0 : index
    %178 = vector.load %arg8[%c0_46, %c0_47] : memref<2x32xf32, #tpu.memory_space<vmem>>, vector<2x32xf32>
    tpu.vector_store %arg8[%c0_46, %c0_47], %171 {strides = array<i32>} : memref<2x32xf32, #tpu.memory_space<vmem>>, vector<2x32xf32>,
    return
  }
}

</mosaic_0001>

<bundles_post_ra>
// kernel: _lstm_forward_impl.1
= control target key start
LH: loop header
LB: loop body
LE: loop exit
PB: predicated region body
PF: predicated region fallthrough
CT: control target
= control target key end

     0   :  { %14 = vsyncpa [#allocation3], 0  ;;  %s1820_s0 = inlined_call_operand.vmem [shape: f32[16,8], index: 0, kind: input, shape index: {}]   ;;  %s1821_s1 = inlined_call_operand.vmem [shape: f32[8,128], index: 1, kind: input, shape index: {}]   ;;  %s1822_s2 = inlined_call_operand.hbm [shape: f32[32,128], index: 2, kind: input, shape index: {}]   ;;  %s1823_s3 = inlined_call_operand.vmem [shape: f32[1,128], index: 3, kind: input, shape index: {}]   ;;  %s1824_s4 = inlined_call_operand.hbm [shape: f32[2,32], index: 4, kind: input, shape index: {}, may-alias: {4,7}]   ;;  %s1825_s5 = inlined_call_operand.hbm [shape: f32[2,32], index: 5, kind: input, shape index: {}, may-alias: {5,8}]   ;;  %s1826_s6 = inlined_call_operand.hbm [shape: f32[8,2,32], index: 6, kind: output, shape index: {0}]   ;;  %s1827_s7 = inlined_call_operand.hbm [shape: f32[2,32], index: 7, kind: output, shape index: {1}, may-alias: {4,7}]   ;;  %s1828_s8 = inlined_call_operand.hbm [shape: f32[2,32], index: 8, kind: output, shape index: {2}, may-alias: {5,8}]  }
   0x1   :  { %15 = vsyncpa [#allocation6], 0 }
   0x2   :  { %16 = vsyncpa [#allocation4], 0 }
   0x3   :  { %17 = vsyncpa [#allocation10], 0  ;;  %s1523_s27 = smov [#allocation5]   ;;  %s1524_s29 = smov [#allocation2]  }
   0x4   :  { %s42_s28 = sshll.u32 %s1523_s27, 4  ;;  %s27_s30 = sshll.u32 %s1524_s29, 4  ;;  %s43_s28 = int_to_ptr.vmem [resolvable:$true] %s42_s28  ;;  %s1583_s30 = int_to_ptr.vmem [resolvable:$true] %s27_s30 }
   0x5   :  { %s1383_s11 = scalar_lea.hbm %s1824_s4, 32 }
   0x6   :  { %p1384_p0 = scmp.ne.s32.totalorder %s1824_s4, %s1383_s11  ;;  %p1387_p1 = scmp.lt.u32.totalorder %s1383_s11, %s1824_s4 }
   0x8   :  { %p1389_p2 = pnand %p1387_p1, %p1384_p0 }
   0xa   :  { %1392 = shalt.err (!%p1389_p2)
}
   0xb   :  { %s1393_s16 = scalar_lea.vmem %s43_s28, 32  ;;  %p1398_p4 = scmp.lt.s32.totalorder %s43_s28, %s43_s28 }
   0xc   :  { %p1394_p3 = scmp.ne.s32.totalorder %s43_s28, %s1393_s16  ;;  %p1399_p5 = scmp.lt.s32.totalorder %s1393_s16, %s1393_s16 }
   0xe   :  { %p1400_p6 = por %p1399_p5, %p1398_p4 }
  0x10   :  { %p1401_p7 = pnand %p1400_p6, %p1394_p3 }
  0x12   :  { %1404 = shalt.err (!%p1401_p7)
}
  0x13   :  { %45 = dma.hbm_to_vmem [thread:$0]  %s1824_s4, 32, %s43_s28, [#allocation6]  }
  0x14   :  { %s1405_s21 = scalar_lea.hbm %s1822_s2, 512 }
  0x15   :  { %p1406_p8 = scmp.ne.s32.totalorder %s1822_s2, %s1405_s21  ;;  %p1409_p9 = scmp.lt.u32.totalorder %s1405_s21, %s1822_s2 }
  0x17   :  { %p1411_p10 = pnand %p1409_p9, %p1406_p8 }
  0x19   :  { %1414 = shalt.err (!%p1411_p10)
}
  0x1a   :  { %s1415_s26 = scalar_lea.vmem %s1583_s30, 512  ;;  %p1420_p12 = scmp.lt.s32.totalorder %s1583_s30, %s1583_s30 }
  0x1b   :  { %p1416_p11 = scmp.ne.s32.totalorder %s1583_s30, %s1415_s26  ;;  %p1421_p13 = scmp.lt.s32.totalorder %s1415_s26, %s1415_s26 }
  0x1d   :  { %p1422_p0 = por %p1421_p13, %p1420_p12 }
  0x1f   :  { %p1423_p1 = pnand %p1422_p0, %p1416_p11 }
  0x21   :  { %1426 = shalt.err (!%p1423_p1)
}
  0x22   :  { %s1525_s4 = smov 128   ;;  %s1526_s27 = smov 8  }
  0x23   :  { %33 = dma.hbm_to_vmem [thread:$0]  %s1822_s2, 512, %s1583_s30, [#allocation3], %s1525_s4, %s1525_s4, %s1526_s27  }
  0x24   :  { %s1527_s9 = smov [#allocation7]   ;;  %s1427_s13 = scalar_lea.hbm %s1825_s5, 32 }
  0x25   :  { %s52_s10 = sshll.u32 %s1527_s9, 4  ;;  %p1428_p2 = scmp.ne.s32.totalorder %s1825_s5, %s1427_s13  ;;  %s53_s10 = int_to_ptr.vmem [resolvable:$true] %s52_s10 }
  0x26   :  { %p1431_p3 = scmp.lt.u32.totalorder %s1427_s13, %s1825_s5 }
  0x28   :  { %p1433_p4 = pnand %p1431_p3, %p1428_p2 }
  0x2a   :  { %1436 = shalt.err (!%p1433_p4)
}
  0x2b   :  { %s1437_s18 = scalar_lea.vmem %s53_s10, 32  ;;  %p1442_p6 = scmp.lt.s32.totalorder %s53_s10, %s53_s10 }
  0x2c   :  { %p1438_p5 = scmp.ne.s32.totalorder %s53_s10, %s1437_s18  ;;  %p1443_p7 = scmp.lt.s32.totalorder %s1437_s18, %s1437_s18 }
  0x2e   :  { %p1444_p8 = por %p1443_p7, %p1442_p6 }
  0x30   :  { %p1445_p9 = pnand %p1444_p8, %p1438_p5 }
  0x32   :  { %1448 = shalt.err (!%p1445_p9)
}
  0x33   :  { %55 = dma.hbm_to_vmem [thread:$0]  %s1825_s5, 32, %s53_s10, [#allocation6]  }
  0x34   :  { %1515 = dma.done.wait [#allocation3], 512  }
  0x35   :  { %1516 = vsyncadd [#allocation3], 4294966784 }
  0x36   :  { %1517 = dma.done.wait [#allocation6], 64  }
  0x37   :  { %1518 = vsyncadd [#allocation6], 4294967232  ;;  %v1528_v0 = vmov 0.0|0.0   ;;  %vm1529_vm0 = vmmov 0   ;;  %v1530_v1 = vmov 0.0   ;;  %vm75_vm1 = vcmask 64512  }
  0x38   :  { %1256 = vmatprep.subr.bf16.mxu1 %v1528_v0  ;;  %1176 = vmatprep.mubr.msk.f32.mxu1 %vm1529_vm0, %v1530_v1  ;;  %v157_v2 = vld [vmem:[#allocation2] sm:$0xff]  ;;  %v158_v3 = vld [vmem:[#allocation2 + $0x8] sm:$0xff]  ;;  %v159_v8 = vld [vmem:[#allocation2 + $0x10] sm:$0xff]  ;;  %vm163_vm2 = vcmask 261120   ;;  %s1531_s24 = smov 64   ;;  %s1532_s25 = smov 32  }
  0x39   :  { %v67_v4 = vld [vmem:[%s1821_s1] sm:$0xff]  ;;  %v1632_v5 = vpack.c.bf16 %v158_v3, %v157_v2  ;;  %v66_v7 = vld [vmem:[%s1820_s0 + $0x8] sm:$0xff]  ;;  %v160_v9 = vld [vmem:[#allocation2 + $0x18] sm:$0xff]  ;;  %vm270_vm3 = vcmask 254976   ;;  %vm493_vm4 = vcmask 259076   ;;  %vm380_vm5 = vcmask 257026  }
  0x3a   :  { %1163 = vmatprep.subr.mxu0 %v67_v4  ;;  %v65_v6 = vld [vmem:[%s1820_s0] sm:$0xff]  ;;  %v1641_v10 = vpack.c.bf16 %v160_v9, %v159_v8  ;;  %vm606_vm6 = vcmask 261126   ;;  %s1534_s26 = smov [#allocation9]   ;;  %s1535_s27 = smov [#allocation8]  }
  0x3b   :  { %1164 = vmatpush3.msra.mxu0 %v67_v4  ;;  %1165 = vmatprep.mubr.msk.f32.mxu0 %vm75_vm1, %v65_v6  ;;  %v161_v11 = vld [vmem:[#allocation5] sm:$0x3]  ;;  %v162_v21 = vld [vmem:[#allocation7] sm:$0x3]  ;;  %s1074_s4 = sshll.u32 %s1534_s26, 4  ;;  %s1061_s28 = sshll.u32 %s1535_s27, 4  ;;  %s1075_s4 = int_to_ptr.vmem [resolvable:$true] %s1074_s4  ;;  %s1765_s28 = int_to_ptr.vmem [resolvable:$true] %s1061_s28 }
  0x3c   :  { %1258 = vmatpush3.bf16.msra.mxu1 %v1632_v5  ;;  %1166 = vmatmul.mubr.msk.f32.vlgmr.msra.gmra.mrb[0].mxu0 %vm75_vm1, %v66_v7  ;;  %v1101_v12 = vld [vmem:[%s1823_s3] ss:$0 sm:$0xff]  ;;  %s1533_s3 = smov 96   ;;  %s1536_s29 = smov [#allocation11]  }
  0x3d   :  { %1259 = vmatprep.subr.bf16.mxu1 %v1528_v0  ;;  %1262 = vmatprep.subr.bf16.mxu0 %v1528_v0  ;;  %s1084_s9 = sshll.u32 %s1536_s29, 4  ;;  %s1449_s10 = scalar_lea.vmem %s1075_s4, 32  ;;  %s1769_s9 = int_to_ptr.vmem [resolvable:$true] %s1084_s9 }
  0x3e   :  { %1264 = vmatpush3.bf16.msra.mxu0 %v1632_v5  ;;  %1187 = vmatprep.mubr.msk.f32.mxu0 %vm1529_vm0, %v1530_v1  ;;  %p1450_p10 = scmp.ne.s32.totalorder %s1075_s4, %s1449_s10  ;;  %p1454_p11 = scmp.lt.s32.totalorder %s1075_s4, %s1075_s4 }
  0x3f   :  { %1265 = vmatprep.subr.bf16.mxu0 %v1528_v0  ;;  %p1455_p12 = scmp.lt.s32.totalorder %s1449_s10, %s1449_s10 }
  0x40   :  { %1261 = vmatpush3.bf16.msra.mxu1 %v1641_v10 }
  0x41   :  { %1268 = vmatprep.subr.bf16.mxu1 %v1528_v0  ;;  %p1456_p13 = por %p1455_p12, %p1454_p11 }
  0x42   :  { %1267 = vmatpush3.bf16.msra.mxu0 %v1641_v10 }
  0x43   :  { %1177 = vmatmul.mubr.msk.f32.vlgmr.msra.gmra.mrb[0].mxu1 %vm163_vm2, %v161_v11  ;;  %1274 = vmatprep.subr.bf16.mxu0 %v1528_v0  ;;  %p1457_p0 = pnand %p1456_p13, %p1450_p10 }
  0x44   :  { %1270 = vmatpush3.bf16.msra.mxu1 %v1632_v5  ;;  %1198 = vmatprep.mubr.msk.f32.mxu1 %vm1529_vm0, %v1530_v1 }
  0x45   :  { %1271 = vmatprep.subr.bf16.mxu1 %v1528_v0 }
  0x48   :  { %1273 = vmatpush3.bf16.msra.mxu1 %v1641_v10 }
  0x49   :  { %1280 = vmatprep.subr.bf16.mxu1 %v1528_v0 }
 0x10f   :  { %v1167_v13 = vpop.f32.mrb[0].mxu0 }
 0x110   :  { %v1663_v14 = vadd.f32 %v1167_v13, %v1101_v12  ;;  %v148_v15 = vpop.f32.mrb[1].mxu0 }
 0x111   :  { %v1665_v16 = vadd.f32 %v1101_v12, %v148_v15 }
 0x116   :  { %v233_v17 = vpop.f32.mrb[0].mxu1 }
 0x117   :  { %v237_v18 = vadd.f32 %v233_v17, %v1665_v16  ;;  %v1178_v19 = vpop.f32.mrb[1].mxu1 }
 0x119   :  { %1319 = vtanh.f32 %v237_v18  ;;  %v1105_v22 = vmul.f32 -1.442695, %v237_v18 }
 0x11b   :  { %1321 = vpow2.f32 %v1105_v22 }
 0x123   :  { %v1320_v20 = vpop.eup %1319 }
 0x124   :  { %251 = vrot.lane.b32.xlu0 %v1320_v20, %s1531_s24 }
 0x125   :  { %v1322_v23 = vpop.eup %1321 }
 0x126   :  { %v241_v24 = vadd.f32 1.0, %v1322_v23 }
 0x128   :  { %246 = vrot.lane.b32.xlu0 %v162_v21, %s1532_s25  ;;  %1323 = vrcp.f32 %v241_v24 }
 0x132   :  { %v1324_v25 = vpop.eup %1323 }
 0x196   :  { %v252_v26 = vpop.permute.xlu0 %251 }
 0x197   :  { %v254_v27 = vmul.f32 %v1324_v25, %v252_v26 }
 0x199   :  { %256 = vrot.lane.b32.xlu1 %v254_v27, %s1532_s25 }
 0x19a   :  { %v247_v28 = vpop.permute.xlu0 %246 }
 0x19b   :  { %v249_v29 = vmul.f32 %v1324_v25, %v247_v28 }
 0x20b   :  { %v257_v30 = vpop.permute.xlu1 %256 }
 0x20c   :  { %v259_v31 = vadd.f32 %v257_v30, %v249_v29 }
 0x20e   :  { %1325 = vtanh.f32 %v259_v31  ;;  %v356_v47 = vrot.slane %v259_v31, 6 }
 0x218   :  { %v1326_v32 = vpop.eup %1325 }
 0x219   :  { %262 = vrot.lane.b32.xlu1 %v1326_v32, %s1531_s24 }
 0x28b   :  { %v263_v33 = vpop.permute.xlu1 %262 }
 0x28c   :  { %v265_v34 = vmul.f32 %v1324_v25, %v263_v33 }
 0x28e   :  { %267 = vrot.lane.b32.xlu0 %v265_v34, %s1532_s25 }
 0x300   :  { %v268_v35 = vpop.permute.xlu0 %267 }
 0x301   :  { %271 = vst.msk [vmem:[#allocation8] sm:$0x3] %vm270_vm3, %v268_v35  ;;  %1188 = vmatmul.mubr.msk.f32.vlgmr.msra.gmra.mrb[2].mxu0 %vm163_vm2, %v268_v35 }
 0x302   :  { %1276 = vmatpush3.bf16.msra.mxu0 %v1632_v5  ;;  %1209 = vmatprep.mubr.msk.f32.mxu0 %vm1529_vm0, %v1530_v1 }
 0x303   :  { %1277 = vmatprep.subr.bf16.mxu0 %v1528_v0 }
 0x306   :  { %1279 = vmatpush3.bf16.msra.mxu0 %v1641_v10 }
 0x307   :  { %1286 = vmatprep.subr.bf16.mxu0 %v1528_v0 }
 0x3d4   :  { %v340_v36 = vpop.f32.mrb[2].mxu0 }
 0x3d5   :  { %v345_v37 = vrot.slane %v340_v36, 6  ;;  %v1189_v38 = vpop.f32.mrb[3].mxu0 }
 0x3d7   :  { %v347_v39 = vadd.f32 %v345_v37, %v1665_v16 }
 0x3d9   :  { %1327 = vtanh.f32 %v347_v39  ;;  %v1107_v41 = vmul.f32 -1.442695, %v347_v39 }
 0x3db   :  { %1329 = vpow2.f32 %v1107_v41 }
 0x3e3   :  { %v1328_v40 = vpop.eup %1327 }
 0x3e4   :  { %360 = vrot.lane.b32.xlu1 %v1328_v40, %s1531_s24 }
 0x3e5   :  { %v1330_v42 = vpop.eup %1329 }
 0x3e6   :  { %v351_v43 = vadd.f32 1.0, %v1330_v42 }
 0x3e8   :  { %1331 = vrcp.f32 %v351_v43 }
 0x3f2   :  { %v1332_v44 = vpop.eup %1331 }
 0x3f3   :  { %v358_v48 = vmul.f32 %v1332_v44, %v356_v47 }
 0x456   :  { %v361_v45 = vpop.permute.xlu1 %360 }
 0x457   :  { %v363_v46 = vmul.f32 %v1332_v44, %v361_v45 }
 0x459   :  { %365 = vrot.lane.b32.xlu0 %v363_v46, %s1532_s25 }
 0x4cb   :  { %v366_v49 = vpop.permute.xlu0 %365 }
 0x4cc   :  { %v368_v50 = vadd.f32 %v366_v49, %v358_v48 }
 0x4ce   :  { %1333 = vtanh.f32 %v368_v50  ;;  %v469_v6 = vrot.slane %v368_v50, 6 }
 0x4d8   :  { %v1334_v51 = vpop.eup %1333 }
 0x4d9   :  { %371 = vrot.lane.b32.xlu1 %v1334_v51, %s1531_s24 }
 0x54b   :  { %v372_v52 = vpop.permute.xlu1 %371 }
 0x54c   :  { %v1685_v53 = vmul.f32 %v1332_v44, %v372_v52 }
 0x54e   :  { %v382_v54 = vrot.slane %v1685_v53, 2 }
 0x550   :  { %383 = vrot.lane.b32.xlu0 %v382_v54, %s1532_s25 }
 0x5c2   :  { %v384_v55 = vpop.permute.xlu0 %383 }
 0x5c3   :  { %1199 = vmatmul.mubr.msk.f32.vlgmr.msra.gmra.mrb[2].mxu1 %vm163_vm2, %v384_v55 }
 0x5c4   :  { %1282 = vmatpush3.bf16.msra.mxu1 %v1632_v5  ;;  %1220 = vmatprep.mubr.msk.f32.mxu1 %vm1529_vm0, %v1530_v1 }
 0x5c5   :  { %1283 = vmatprep.subr.bf16.mxu1 %v1528_v0 }
 0x5c8   :  { %1285 = vmatpush3.bf16.msra.mxu1 %v1641_v10 }
 0x5c9   :  { %1292 = vmatprep.subr.bf16.mxu1 %v1528_v0 }
 0x696   :  { %v453_v56 = vpop.f32.mrb[2].mxu1 }
 0x697   :  { %v458_v57 = vrot.slane %v453_v56, 4  ;;  %v1200_v58 = vpop.f32.mrb[3].mxu1 }
 0x699   :  { %v460_v59 = vadd.f32 %v458_v57, %v1665_v16 }
 0x69b   :  { %1335 = vtanh.f32 %v460_v59  ;;  %v1109_v61 = vmul.f32 -1.442695, %v460_v59 }
 0x69d   :  { %1337 = vpow2.f32 %v1109_v61 }
 0x6a5   :  { %v1336_v60 = vpop.eup %1335 }
 0x6a6   :  { %473 = vrot.lane.b32.xlu1 %v1336_v60, %s1531_s24 }
 0x6a7   :  { %v1338_v62 = vpop.eup %1337 }
 0x6a8   :  { %v464_v63 = vadd.f32 1.0, %v1338_v62 }
 0x6aa   :  { %1339 = vrcp.f32 %v464_v63 }
 0x6b4   :  { %v1340_v2 = vpop.eup %1339 }
 0x6b5   :  { %v471_v7 = vmul.f32 %v1340_v2, %v469_v6 }
 0x718   :  { %v474_v3 = vpop.permute.xlu1 %473 }
 0x719   :  { %v476_v4 = vmul.f32 %v1340_v2, %v474_v3 }
 0x71b   :  { %478 = vrot.lane.b32.xlu0 %v476_v4, %s1532_s25 }
 0x78d   :  { %v479_v8 = vpop.permute.xlu0 %478 }
 0x78e   :  { %v481_v9 = vadd.f32 %v479_v8, %v471_v7 }
 0x790   :  { %1341 = vtanh.f32 %v481_v9  ;;  %v582_v29 = vrot.slane %v481_v9, 6 }
 0x79a   :  { %v1342_v11 = vpop.eup %1341 }
 0x79b   :  { %484 = vrot.lane.b32.xlu1 %v1342_v11, %s1531_s24 }
 0x80d   :  { %v485_v12 = vpop.permute.xlu1 %484 }
 0x80e   :  { %v1700_v13 = vmul.f32 %v1340_v2, %v485_v12 }
 0x810   :  { %v495_v15 = vrot.slane %v1700_v13, 4 }
 0x812   :  { %496 = vrot.lane.b32.xlu0 %v495_v15, %s1532_s25 }
 0x884   :  { %v497_v17 = vpop.permute.xlu0 %496 }
 0x885   :  { %1210 = vmatmul.mubr.msk.f32.vlgmr.msra.gmra.mrb[4].mxu0 %vm163_vm2, %v497_v17 }
 0x886   :  { %1288 = vmatpush3.bf16.msra.mxu0 %v1632_v5  ;;  %1231 = vmatprep.mubr.msk.f32.mxu0 %vm1529_vm0, %v1530_v1 }
 0x887   :  { %1289 = vmatprep.subr.bf16.mxu0 %v1528_v0 }
 0x88a   :  { %1291 = vmatpush3.bf16.msra.mxu0 %v1641_v10 }
 0x88b   :  { %1298 = vmatprep.subr.bf16.mxu0 %v1528_v0 }
 0x958   :  { %v566_v18 = vpop.f32.mrb[4].mxu0 }
 0x959   :  { %v571_v19 = vrot.slane %v566_v18, 2  ;;  %v1211_v20 = vpop.f32.mrb[5].mxu0 }
 0x95b   :  { %v573_v21 = vadd.f32 %v571_v19, %v1665_v16 }
 0x95d   :  { %1343 = vtanh.f32 %v573_v21  ;;  %v1111_v23 = vmul.f32 -1.442695, %v573_v21 }
 0x95f   :  { %1345 = vpow2.f32 %v1111_v23 }
 0x967   :  { %v1344_v22 = vpop.eup %1343 }
 0x968   :  { %586 = vrot.lane.b32.xlu1 %v1344_v22, %s1531_s24 }
 0x969   :  { %v1346_v24 = vpop.eup %1345 }
 0x96a   :  { %v577_v25 = vadd.f32 1.0, %v1346_v24 }
 0x96c   :  { %1347 = vrcp.f32 %v577_v25 }
 0x976   :  { %v1348_v26 = vpop.eup %1347 }
 0x977   :  { %v584_v30 = vmul.f32 %v1348_v26, %v582_v29 }
 0x9da   :  { %v587_v27 = vpop.permute.xlu1 %586 }
 0x9db   :  { %v589_v28 = vmul.f32 %v1348_v26, %v587_v27 }
 0x9dd   :  { %591 = vrot.lane.b32.xlu0 %v589_v28, %s1532_s25 }
 0xa4f   :  { %v592_v31 = vpop.permute.xlu0 %591 }
 0xa50   :  { %v594_v32 = vadd.f32 %v592_v31, %v584_v30 }
 0xa52   :  { %1349 = vtanh.f32 %v594_v32  ;;  %v692_v47 = vrot.slane %v594_v32, 6 }
 0xa5c   :  { %v1350_v16 = vpop.eup %1349 }
 0xa5d   :  { %597 = vrot.lane.b32.xlu1 %v1350_v16, %s1531_s24 }
 0xacf   :  { %v598_v33 = vpop.permute.xlu1 %597 }
 0xad0   :  { %v1715_v34 = vmul.f32 %v1348_v26, %v598_v33 }
 0xad2   :  { %v608_v35 = vrot.slane %v1715_v34, 6 }
 0xad4   :  { %609 = vrot.lane.b32.xlu0 %v608_v35, %s1532_s25 }
 0xb46   :  { %v610_v36 = vpop.permute.xlu0 %609 }
 0xb47   :  { %1221 = vmatmul.mubr.msk.f32.vlgmr.msra.gmra.mrb[4].mxu1 %vm163_vm2, %v610_v36 }
 0xb48   :  { %1294 = vmatpush3.bf16.msra.mxu1 %v1632_v5  ;;  %1242 = vmatprep.mubr.msk.f32.mxu1 %vm1529_vm0, %v1530_v1 }
 0xb49   :  { %1295 = vmatprep.subr.bf16.mxu1 %v1528_v0 }
 0xb4c   :  { %1297 = vmatpush3.bf16.msra.mxu1 %v1641_v10 }
 0xc1a   :  { %v679_v37 = vpop.f32.mrb[4].mxu1 }
 0xc1b   :  { %v683_v38 = vadd.f32 %v679_v37, %v1663_v14  ;;  %v1222_v39 = vpop.f32.mrb[5].mxu1 }
 0xc1d   :  { %1351 = vtanh.f32 %v683_v38  ;;  %v1113_v41 = vmul.f32 -1.442695, %v683_v38 }
 0xc1f   :  { %1353 = vpow2.f32 %v1113_v41 }
 0xc27   :  { %v1352_v40 = vpop.eup %1351 }
 0xc28   :  { %696 = vrot.lane.b32.xlu1 %v1352_v40, %s1531_s24 }
 0xc29   :  { %v1354_v42 = vpop.eup %1353 }
 0xc2a   :  { %v687_v43 = vadd.f32 1.0, %v1354_v42 }
 0xc2c   :  { %1355 = vrcp.f32 %v687_v43 }
 0xc36   :  { %v1356_v44 = vpop.eup %1355 }
 0xc37   :  { %v694_v48 = vmul.f32 %v1356_v44, %v692_v47 }
 0xc9a   :  { %v697_v45 = vpop.permute.xlu1 %696 }
 0xc9b   :  { %v699_v46 = vmul.f32 %v1356_v44, %v697_v45 }
 0xc9d   :  { %701 = vrot.lane.b32.xlu0 %v699_v46, %s1532_s25 }
 0xd0f   :  { %v702_v49 = vpop.permute.xlu0 %701 }
 0xd10   :  { %v704_v50 = vadd.f32 %v702_v49, %v694_v48 }
 0xd12   :  { %1357 = vtanh.f32 %v704_v50 }
 0xd1c   :  { %v1358_v51 = vpop.eup %1357 }
 0xd1d   :  { %707 = vrot.lane.b32.xlu1 %v1358_v51, %s1531_s24 }
 0xd8f   :  { %v708_v52 = vpop.permute.xlu1 %707 }
 0xd90   :  { %v710_v54 = vmul.f32 %v1356_v44, %v708_v52 }
 0xd92   :  { %712 = vrot.lane.b32.xlu0 %v710_v54, %s1532_s25 }
 0xe04   :  { %v713_v55 = vpop.permute.xlu0 %712 }
 0xe05   :  { %716 = vst.msk [vmem:[#allocation8 + $0x8] sm:$0x3] %vm270_vm3, %v713_v55  ;;  %1232 = vmatmul.mubr.msk.f32.vlgmr.msra.gmra.mrb[6].mxu0 %vm163_vm2, %v713_v55 }
 0xe06   :  { %1300 = vmatpush3.bf16.msra.mxu0 %v1632_v5  ;;  %1253 = vmatprep.mubr.msk.f32.mxu0 %vm1529_vm0, %v1530_v1 }
 0xe07   :  { %1301 = vmatprep.subr.bf16.mxu0 %v1528_v0  ;;  %v801_v0 = vrot.slane %v704_v50, 6 }
 0xe0a   :  { %1303 = vmatpush3.bf16.msra.mxu0 %v1641_v10 }
 0xed8   :  { %v785_v56 = vpop.f32.mrb[6].mxu0 }
 0xed9   :  { %v790_v57 = vrot.slane %v785_v56, 6  ;;  %v1233_v58 = vpop.f32.mrb[7].mxu0 }
 0xedb   :  { %v792_v59 = vadd.f32 %v790_v57, %v1663_v14 }
 0xedd   :  { %1359 = vtanh.f32 %v792_v59  ;;  %v1115_v61 = vmul.f32 -1.442695, %v792_v59 }
 0xedf   :  { %1361 = vpow2.f32 %v1115_v61 }
 0xee7   :  { %v1360_v60 = vpop.eup %1359 }
 0xee8   :  { %805 = vrot.lane.b32.xlu1 %v1360_v60, %s1531_s24 }
 0xee9   :  { %v1362_v62 = vpop.eup %1361 }
 0xeea   :  { %v796_v5 = vadd.f32 1.0, %v1362_v62 }
 0xeec   :  { %1363 = vrcp.f32 %v796_v5 }
 0xef6   :  { %v1364_v63 = vpop.eup %1363 }
 0xef7   :  { %v803_v10 = vmul.f32 %v1364_v63, %v801_v0 }
 0xf5a   :  { %v806_v1 = vpop.permute.xlu1 %805 }
 0xf5b   :  { %v808_v2 = vmul.f32 %v1364_v63, %v806_v1 }
 0xf5d   :  { %810 = vrot.lane.b32.xlu0 %v808_v2, %s1532_s25 }
 0xfcf   :  { %v811_v3 = vpop.permute.xlu0 %810 }
 0xfd0   :  { %v813_v4 = vadd.f32 %v811_v3, %v803_v10 }
 0xfd2   :  { %1365 = vtanh.f32 %v813_v4  ;;  %v913_v26 = vrot.slane %v813_v4, 6 }
 0xfdc   :  { %v1366_v6 = vpop.eup %1365 }
 0xfdd   :  { %816 = vrot.lane.b32.xlu1 %v1366_v6, %s1531_s24 }
0x104f   :  { %v817_v7 = vpop.permute.xlu1 %816 }
0x1050   :  { %v819_v8 = vmul.f32 %v1364_v63, %v817_v7 }
0x1052   :  { %v826_v9 = vrot.slane %v819_v8, 2 }
0x1054   :  { %827 = vrot.lane.b32.xlu0 %v826_v9, %s1532_s25 }
0x10c6   :  { %v828_v11 = vpop.permute.xlu0 %827 }
0x10c7   :  { %1243 = vmatmul.mubr.msk.f32.vlgmr.msra.gmra.mrb[6].mxu1 %vm163_vm2, %v828_v11 }
0x119a   :  { %v897_v12 = vpop.f32.mrb[6].mxu1 }
0x119b   :  { %v902_v15 = vrot.slane %v897_v12, 4  ;;  %v1244_v17 = vpop.f32.mrb[7].mxu1 }
0x119d   :  { %v904_v18 = vadd.f32 %v902_v15, %v1663_v14 }
0x119f   :  { %1367 = vtanh.f32 %v904_v18  ;;  %v1117_v20 = vmul.f32 -1.442695, %v904_v18 }
0x11a1   :  { %1369 = vpow2.f32 %v1117_v20 }
0x11a9   :  { %v1368_v19 = vpop.eup %1367 }
0x11aa   :  { %917 = vrot.lane.b32.xlu1 %v1368_v19, %s1531_s24 }
0x11ab   :  { %v1370_v21 = vpop.eup %1369 }
0x11ac   :  { %v908_v22 = vadd.f32 1.0, %v1370_v21 }
0x11ae   :  { %1371 = vrcp.f32 %v908_v22 }
0x11b8   :  { %v1372_v23 = vpop.eup %1371 }
0x11b9   :  { %v915_v27 = vmul.f32 %v1372_v23, %v913_v26 }
0x121c   :  { %v918_v24 = vpop.permute.xlu1 %917 }
0x121d   :  { %v920_v25 = vmul.f32 %v1372_v23, %v918_v24 }
0x121f   :  { %922 = vrot.lane.b32.xlu0 %v920_v25, %s1532_s25 }
0x1291   :  { %v923_v28 = vpop.permute.xlu0 %922 }
0x1292   :  { %v925_v29 = vadd.f32 %v923_v28, %v915_v27 }
0x1294   :  { %1373 = vtanh.f32 %v925_v29 }
0x129e   :  { %v1374_v30 = vpop.eup %1373 }
0x129f   :  { %928 = vrot.lane.b32.xlu1 %v1374_v30, %s1531_s24 }
0x1311   :  { %v929_v31 = vpop.permute.xlu1 %928 }
0x1312   :  { %v931_v32 = vmul.f32 %v1372_v23, %v929_v31 }
0x1314   :  { %v938_v16 = vrot.slane %v931_v32, 4 }
0x1316   :  { %939 = vrot.lane.b32.xlu0 %v938_v16, %s1532_s25 }
0x1388   :  { %v940_v33 = vpop.permute.xlu0 %939 }
0x1389   :  { %1254 = vmatmul.mubr.msk.f32.vlgmr.msra.gmra.mrb[8].mxu0 %vm163_vm2, %v940_v33 }
0x145c   :  { %v1009_v35 = vpop.f32.mrb[8].mxu0 }
0x145d   :  { %v1014_v36 = vrot.slane %v1009_v35, 2  ;;  %v1255_v37 = vpop.f32.mrb[9].mxu0 }
0x145f   :  { %v1016_v38 = vadd.f32 %v1014_v36, %v1663_v14  ;;  %v1025_v14 = vrot.slane %v925_v29, 6 }
0x1461   :  { %1375 = vtanh.f32 %v1016_v38  ;;  %v1119_v40 = vmul.f32 -1.442695, %v1016_v38 }
0x1463   :  { %1377 = vpow2.f32 %v1119_v40 }
0x146b   :  { %v1376_v39 = vpop.eup %1375 }
0x146c   :  { %1029 = vrot.lane.b32.xlu1 %v1376_v39, %s1531_s24 }
0x146d   :  { %v1378_v41 = vpop.eup %1377 }
0x146e   :  { %v1020_v42 = vadd.f32 1.0, %v1378_v41 }
0x1470   :  { %1379 = vrcp.f32 %v1020_v42 }
0x147a   :  { %v1380_v43 = vpop.eup %1379 }
0x147b   :  { %v1027_v46 = vmul.f32 %v1380_v43, %v1025_v14 }
0x14de   :  { %v1030_v44 = vpop.permute.xlu1 %1029 }
0x14df   :  { %v1032_v45 = vmul.f32 %v1380_v43, %v1030_v44 }
0x14e1   :  { %1034 = vrot.lane.b32.xlu0 %v1032_v45, %s1532_s25 }
0x14e5   :  { %489 = vrot.lane.b32.xlu0 %v1700_v13, %s1532_s25 }
0x14e9   :  { %821 = vrot.lane.b32.xlu0 %v819_v8, %s1532_s25 }
0x1553   :  { %v1035_v47 = vpop.permute.xlu0 %1034 }
0x1554   :  { %v1037_v48 = vadd.f32 %v1035_v47, %v1027_v46 }
0x1556   :  { %1381 = vtanh.f32 %v1037_v48 }
0x1557   :  { %v490_v49 = vpop.permute.xlu0 %489 }
0x1558   :  { %494 = vst.msk [vmem:[#allocation8] sm:$0x30] %vm493_vm4, %v490_v49 }
0x155b   :  { %v822_v50 = vpop.permute.xlu0 %821 }
0x155c   :  { %825 = vst.msk [vmem:[#allocation8 + $0x8] sm:$0xc] %vm380_vm5, %v822_v50 }
0x1560   :  { %v1382_v51 = vpop.eup %1381 }
0x1561   :  { %1040 = vrot.lane.b32.xlu1 %v1382_v51, %s1531_s24 }
0x1565   :  { %376 = vrot.lane.b32.xlu1 %v1685_v53, %s1532_s25 }
0x1569   :  { %602 = vrot.lane.b32.xlu1 %v1715_v34, %s1532_s25 }
0x156d   :  { %933 = vrot.lane.b32.xlu1 %v931_v32, %s1532_s25 }
0x15d3   :  { %v1041_v13 = vpop.permute.xlu1 %1040 }
0x15d4   :  { %v1043_v52 = vmul.f32 %v1380_v43, %v1041_v13 }
0x15d6   :  { %1045 = vrot.lane.b32.xlu0 %v1043_v52, %s1532_s25 }
0x15d7   :  { %v377_v54 = vpop.permute.xlu1 %376 }
0x15d8   :  { %381 = vst.msk [vmem:[#allocation8] sm:$0xc] %vm380_vm5, %v377_v54 }
0x15da   :  { %1052 = vrot.lane.b32.xlu0 %v1037_v48, %s1533_s3 }
0x15db   :  { %v603_v55 = vpop.permute.xlu1 %602 }
0x15dc   :  { %607 = vst.msk [vmem:[#allocation8] sm:$0xc0] %vm606_vm6, %v603_v55 }
0x15df   :  { %v934_v56 = vpop.permute.xlu1 %933 }
0x15e0   :  { %937 = vst.msk [vmem:[#allocation8 + $0x8] sm:$0x30] %vm493_vm4, %v934_v56 }
0x1648   :  { %v1046_v53 = vpop.permute.xlu0 %1045 }
0x1649   :  { %1049 = vst.msk [vmem:[#allocation8 + $0x8] sm:$0xc0] %vm606_vm6, %v1046_v53  ;;  %1050 = vst.msk [vmem:[#allocation9 - $0x6] sm:$0xc0] %vm606_vm6, %v1046_v53 }
0x164a   :  { %1460 = shalt.err (!%p1457_p0)
}
0x164b   :  { %s1461_s13 = scalar_lea.hbm %s1827_s7, 32 }
0x164c   :  { %p1462_p1 = scmp.ne.s32.totalorder %s1827_s7, %s1461_s13  ;;  %p1465_p2 = scmp.lt.u32.totalorder %s1461_s13, %s1827_s7 }
0x164e   :  { %p1467_p3 = pnand %p1465_p2, %p1462_p1 }
0x1650   :  { %1470 = shalt.err (!%p1467_p3)
}
0x1651   :  { %1077 = dma.vmem_to_hbm [thread:$0]  %s1075_s4, 32, %s1827_s7, [#allocation10]  }
0x1652   :  { %s1471_s30 = scalar_lea.vmem %s1765_s28, 256  ;;  %p1476_p5 = scmp.lt.s32.totalorder %s1765_s28, %s1765_s28 }
0x1653   :  { %p1472_p4 = scmp.ne.s32.totalorder %s1765_s28, %s1471_s30  ;;  %p1477_p6 = scmp.lt.s32.totalorder %s1471_s30, %s1471_s30 }
0x1655   :  { %p1478_p7 = por %p1477_p6, %p1476_p5 }
0x1657   :  { %p1479_p8 = pnand %p1478_p7, %p1472_p4 }
0x1659   :  { %1482 = shalt.err (!%p1479_p8)
}
0x165a   :  { %s1483_s5 = scalar_lea.hbm %s1826_s6, 256 }
0x165b   :  { %p1484_p9 = scmp.ne.s32.totalorder %s1826_s6, %s1483_s5  ;;  %p1487_p10 = scmp.lt.u32.totalorder %s1483_s5, %s1826_s6 }
0x165d   :  { %p1489_p11 = pnand %p1487_p10, %p1484_p9 }
0x165f   :  { %1492 = shalt.err (!%p1489_p11)
}
0x1660   :  { %s1537_s7 = smov 2   ;;  %v1053_v34 = vpop.permute.xlu0 %1052  ;;  %s1493_s3 = scalar_lea.vmem %s1769_s9, 32 }
0x1661   :  { %1067 = dma.vmem_to_hbm [thread:$0]  %s1765_s28, 256, %s1826_s6, [#allocation4], %s1532_s25, %s1532_s25, %s1537_s7   ;;  %1055 = vst.msk [vmem:[#allocation11 - $0x6] sm:$0xc0] %vm606_vm6, %v1053_v34 }
0x1662   :  { %p1494_p12 = scmp.ne.s32.totalorder %s1769_s9, %s1493_s3  ;;  %p1498_p13 = scmp.lt.s32.totalorder %s1769_s9, %s1769_s9 }
0x1663   :  { %p1499_p0 = scmp.lt.s32.totalorder %s1493_s3, %s1493_s3 }
0x1665   :  { %p1500_p1 = por %p1499_p0, %p1498_p13 }
0x1667   :  { %p1501_p2 = pnand %p1500_p1, %p1494_p12 }
0x1669   :  { %1504 = shalt.err (!%p1501_p2)
}
0x166a   :  { %s1505_s27 = scalar_lea.hbm %s1828_s8, 32 }
0x166b   :  { %p1506_p3 = scmp.ne.s32.totalorder %s1828_s8, %s1505_s27  ;;  %p1509_p4 = scmp.lt.u32.totalorder %s1505_s27, %s1828_s8 }
0x166d   :  { %p1511_p5 = pnand %p1509_p4, %p1506_p3 }
0x166f   :  { %1514 = shalt.err (!%p1511_p5)
}
0x1670   :  { %1087 = dma.vmem_to_hbm [thread:$0]  %s1769_s9, 32, %s1828_s8, [#allocation10]  }
0x1671   :  { %1519 = dma.done.wait [#allocation4], 256  }
0x1672   :  { %1520 = vsyncadd [#allocation4], 4294967040 }
0x1673   :  { %1521 = dma.done.wait [#allocation10], 64  }
0x1674   :  { %1522 = vsyncadd [#allocation10], 4294967232 }
0x1675   :  { %1097 = vsyncpa [#allocation3], 1 }
0x1676   :  { %1098 = vsyncpa [#allocation6], 1 }
0x1677   :  { %1099 = vsyncpa [#allocation4], 1 }
0x1678   :  { %1100 = vsyncpa [#allocation10], 1 }

</bundles_post_ra>
